<compile_context>
chip_gen: v5e
topology: v5e:2x2
jax: 0.10.0
libtpu: 0.0.40
codegen_flags: <defaults>
</compile_context>

<pallas_src>
import jax
import jax.numpy as jnp
from jax.experimental import pallas as pl
from jax.experimental.pallas import tpu as pltpu


def _round_up(n, m):
    return ((n + m - 1) // m) * m


def _sigmoid(z):
    # Numerically-stable sigmoid on the EUP tanh path: sigma(z) = 0.5*(1+tanh(z/2)).
    # Avoids exp(-z) overflow and keeps the transcendental in the (otherwise idle)
    # EUP slot while the kernel is memory-bound.
    return 0.5 * (jnp.tanh(0.5 * z) + 1.0)


def _convlstm_kernel(x_ref, h_ref, c_ref, wx_ref, wh_ref, b_ref, out_ref):
    H = c_ref.shape[-1]

    # Gate pre-activations: (TB, Din)·(Din, 4H) + (TB, H)·(H, 4H) on the MXU,
    # f32 accumulation.  Weights arrive pre-transposed and in the model dtype
    # (bf16-capable) -- no in-kernel relayout, no wrapper upcast.
    gates = jnp.dot(x_ref[...], wx_ref[...], preferred_element_type=jnp.float32)
    gates = gates + jnp.dot(h_ref[...], wh_ref[...], preferred_element_type=jnp.float32)
    gates = gates + b_ref[...]                                  # (TB, 4H) f32

    i = _sigmoid(gates[:, 0 * H:1 * H])
    f = _sigmoid(gates[:, 1 * H:2 * H])
    o = _sigmoid(gates[:, 2 * H:3 * H])
    g = jnp.tanh(gates[:, 3 * H:4 * H])

    c_next = f * c_ref[...].astype(jnp.float32) + i * g
    h_next = o * jnp.tanh(c_next)

    # Packed output: [h_next | c_next] into one (TB, 2H) block -> a single,
    # lane-denser writeback slab per tile instead of two narrow outputs.
    out_ref[:, 0 * H:1 * H] = h_next.astype(out_ref.dtype)
    out_ref[:, 1 * H:2 * H] = c_next.astype(out_ref.dtype)


def prepare_convlstm_params(conv_w, conv_b, input_dim):
    """One-time parameter prep (hoist out of the per-timestep path).

    conv_w: (4H, Din+H, K) Conv1d weight, conv_b: (4H,) bias.
    Returns (wx_t, wh_t, b) with wx_t: (Din, 4H), wh_t: (H, 4H), b: (1, 4H) f32.
    Weights keep the model dtype (bf16 stays bf16 -> half the resident VMEM /
    DMA and the native bf16 MXU path on v6e/v7x); accumulation is f32 in-kernel.
    """
    four_h, _din_plus_h, K = conv_w.shape
    # TODO(synk): even kernel_size produces a length-2 conv output in the
    # PyTorch module (shape drift downstream); only the standard odd-kernel
    # ConvLSTM configuration is supported here.
    assert K % 2 == 1, "ConvLSTMCell Pallas kernel supports odd kernel_size only"
    w_center = conv_w[:, :, K // 2]                              # (4H, Din+H)
    wx_t = jnp.transpose(w_center[:, :input_dim])                # (Din, 4H)
    wh_t = jnp.transpose(w_center[:, input_dim:])                # (H,   4H)
    b = conv_b.reshape(1, four_h).astype(jnp.float32)            # (1, 4H), tiny
    return wx_t, wh_t, b


def conv_lstm_cell(x, cur_state, conv_w=None, conv_b=None, *, params=None,
                   tile_b=512, vmem_limit_bytes=None):
    """ConvLSTMCell forward.

    x:         (B, Din)          input at this timestep
    cur_state: (h_cur, c_cur), each (B, H, 1)
    conv_w:    (4H, Din+H, K)    Conv1d weight  (or pass params=... instead)
    conv_b:    (4H,)             Conv1d bias
    params:    optional output of prepare_convlstm_params (recurrent callers
               should prepare once and reuse every step)
    tile_b:    batch tile size; sweep 512-2048 per TPU generation.
    Returns (h_next, c_next), each (B, H, 1).
    """
    h_cur, c_cur = cur_state
    B, Din = x.shape
    H = h_cur.shape[1]

    if params is None:
        # Fine for a one-off step; recurrent callers should hoist this.
        params = prepare_convlstm_params(conv_w, conv_b, Din)
    wx_t, wh_t, b = params
    assert wx_t.shape == (Din, 4 * H) and wh_t.shape == (H, 4 * H)

    x2 = x                                                       # (B, Din)
    h2 = h_cur.reshape(B, H)
    c2 = c_cur.reshape(B, H)

    # ---- batch tiling -----------------------------------------------------
    # Large tiles amortize the ~0.35us per-grid-step overhead (mem-bound
    # kernels: ~29% of HBM roofline at 128-wide tiles vs ~85% at 512-wide).
    # Mid-sized batches are still split into (at least) two tiles so both
    # TensorCores on v7x get work via the "parallel" grid axis.
    MIN_TILE = 8
    tile_b = max(MIN_TILE, _round_up(int(tile_b), MIN_TILE))
    if B > 2 * tile_b:
        TB = tile_b                                   # many tiles of tile_b
    elif B >= 2 * MIN_TILE:
        TB = _round_up(pl.cdiv(B, 2), MIN_TILE)       # exactly 2 tiles
    else:
        TB = B                                        # tiny batch: one full block
    Bp = _round_up(B, TB)
    if Bp != B:
        pad = Bp - B
        x2 = jnp.pad(x2, ((0, pad), (0, 0)))
        h2 = jnp.pad(h2, ((0, pad), (0, 0)))
        c2 = jnp.pad(c2, ((0, pad), (0, 0)))
    grid = (Bp // TB,)

    # Packed output dtype: wide enough to not re-round an f32-carried cell
    # state; h/c are cast back to their own dtypes after the split.
    out_dtype = jnp.result_type(x.dtype, h_cur.dtype, c_cur.dtype)

    # ---- explicit VMEM budget (v7x has 64 MiB physical, v5e's scoped default
    # is only 16 MiB): double-buffered per-tile blocks + resident weights. ----
    def _isz(dt):
        return jnp.dtype(dt).itemsize

    est = (2 * (TB * Din * _isz(x2.dtype)
                + TB * H * _isz(h2.dtype)
                + TB * H * _isz(c2.dtype)
                + TB * 2 * H * _isz(out_dtype))
           + 2 * (Din * 4 * H * _isz(wx_t.dtype)
                  + H * 4 * H * _isz(wh_t.dtype)
                  + 4 * H * 4))
    if vmem_limit_bytes is None:
        vmem_limit_bytes = int(min(max(2 * est, 32 * 1024 * 1024),
                                   64 * 1024 * 1024))

    packed = pl.pallas_call(
        _convlstm_kernel,
        out_shape=jax.ShapeDtypeStruct((Bp, 2 * H), out_dtype),
        grid_spec=pltpu.PrefetchScalarGridSpec(
            num_scalar_prefetch=0,
            grid=grid,
            in_specs=[
                pl.BlockSpec((TB, Din), lambda i: (i, 0)),        # x tile
                pl.BlockSpec((TB, H), lambda i: (i, 0)),          # h tile
                pl.BlockSpec((TB, H), lambda i: (i, 0)),          # c tile
                pl.BlockSpec((Din, 4 * H), lambda i: (0, 0)),     # Wx^T (resident)
                pl.BlockSpec((H, 4 * H), lambda i: (0, 0)),       # Wh^T (resident)
                pl.BlockSpec((1, 4 * H), lambda i: (0, 0)),       # bias (resident)
            ],
            out_specs=pl.BlockSpec((TB, 2 * H), lambda i: (i, 0)),
        ),
        compiler_params=pltpu.CompilerParams(
            dimension_semantics=("parallel",),     # batch tiles shard across TCs
            vmem_limit_bytes=vmem_limit_bytes,
        ),
    )(x2, h2, c2, wx_t, wh_t, b)

    h_next = packed[:B, :H].astype(h_cur.dtype).reshape(B, H, 1)
    c_next = packed[:B, H:].astype(c_cur.dtype).reshape(B, H, 1)
    return h_next, c_next


if __name__ == "__main__":
    key = jax.random.PRNGKey(0)
    k_x, k_h, k_c, k_w, k_b = jax.random.split(key, 5)

    B, DIN, H, K = 2, 4, 32, 3
    x = jax.random.normal(k_x, (B, DIN), dtype=jnp.float32)
    h = jax.random.normal(k_h, (B, H, 1), dtype=jnp.float32) * 0.5
    c = jax.random.normal(k_c, (B, H, 1), dtype=jnp.float32) * 0.5
    conv_w = jax.random.normal(k_w, (4 * H, DIN + H, K), dtype=jnp.float32) * 0.1
    conv_b = jax.random.normal(k_b, (4 * H,), dtype=jnp.float32) * 0.1

    # Hoisted, one-time weight prep (reuse for every timestep).
    params = prepare_convlstm_params(conv_w, conv_b, DIN)

    h_next, c_next = conv_lstm_cell(x, (h, c), params=params)
    h_next, c_next = jax.block_until_ready((h_next, c_next))

    # Pure-JAX reference implementing the PyTorch forward exactly
    # (full padded Conv1d, not the center-tap shortcut used by the kernel).
    pad = K // 2
    combined = jnp.concatenate([x[:, :, None], h], axis=1)              # (B, DIN+H, 1)
    combined_p = jnp.pad(combined, ((0, 0), (0, 0), (pad, pad)))        # (B, DIN+H, K)
    gates = jnp.einsum("bck,ock->bo", combined_p, conv_w) + conv_b      # (B, 4H)
    i_g = jax.nn.sigmoid(gates[:, :H])
    f_g = jax.nn.sigmoid(gates[:, H:2 * H])
    o_g = jax.nn.sigmoid(gates[:, 2 * H:3 * H])
    g_g = jnp.tanh(gates[:, 3 * H:])
    c_exp = f_g * c[:, :, 0] + i_g * g_g
    h_exp = o_g * jnp.tanh(c_exp)

    assert h_next.shape == (B, H, 1) and c_next.shape == (B, H, 1)
    assert jnp.allclose(h_next[:, :, 0], h_exp, atol=1e-4, rtol=1e-4), "h_next mismatch"
    assert jnp.allclose(c_next[:, :, 0], c_exp, atol=1e-4, rtol=1e-4), "c_next mismatch"
    print("KERNEL_OK")
</pallas_src>

<mosaic_0001>
module attributes {stable_mosaic.version = 11 : i64} {
  func.func @_convlstm_kernel(%arg0: i32, %arg1: memref<2x4xf32, #tpu.memory_space<vmem>>, %arg2: memref<2x32xf32, #tpu.memory_space<vmem>>, %arg3: memref<2x32xf32, #tpu.memory_space<vmem>>, %arg4: memref<4x128xf32, #tpu.memory_space<vmem>>, %arg5: memref<32x128xf32, #tpu.memory_space<vmem>>, %arg6: memref<1x128xf32, #tpu.memory_space<vmem>>, %arg7: memref<2x64xf32, #tpu.memory_space<vmem>>) attributes {dimension_semantics = [#tpu.dimension_semantics<parallel>], iteration_bounds = array<i64: 1>, scalar_prefetch = 0 : i64, scratch_operands = 0 : i64, tpu.core_type = #tpu.core_type<tc>, window_params = [{transform_indices = @transform_0, window_bounds = array<i64: 2, 4>}, {transform_indices = @transform_1, window_bounds = array<i64: 2, 32>}, {transform_indices = @transform_2, window_bounds = array<i64: 2, 32>}, {pipeline_mode = #tpu.pipeline_mode<synchronous>, transform_indices = @transform_3, window_bounds = array<i64: 4, 128>}, {pipeline_mode = #tpu.pipeline_mode<synchronous>, transform_indices = @transform_4, window_bounds = array<i64: 32, 128>}, {pipeline_mode = #tpu.pipeline_mode<synchronous>, transform_indices = @transform_5, window_bounds = array<i64: 1, 128>}, {transform_indices = @transform_6, window_bounds = array<i64: 2, 64>}]} {
    %c0 = arith.constant 0 : index
    %c0_0 = arith.constant 0 : index
    %0 = vector.load %arg1[%c0, %c0_0] : memref<2x4xf32, #tpu.memory_space<vmem>>, vector<2x4xf32>
    %c0_1 = arith.constant 0 : index
    %c0_2 = arith.constant 0 : index
    %1 = vector.load %arg4[%c0_1, %c0_2] : memref<4x128xf32, #tpu.memory_space<vmem>>, vector<4x128xf32>
    %cst = arith.constant dense<0.000000e+00> : vector<2x128xf32>
    %2 = tpu.matmul %0, %1, %cst {dimension_numbers = #tpu.dot_dimension_numbers<[1], [0], [0], [1], [0, 0, 1, 1], [], []>} : vector<2x4xf32>, vector<4x128xf32>, vector<2x128xf32> -> vector<2x128xf32>
    %c0_3 = arith.constant 0 : index
    %c0_4 = arith.constant 0 : index
    %3 = vector.load %arg2[%c0_3, %c0_4] : memref<2x32xf32, #tpu.memory_space<vmem>>, vector<2x32xf32>
    %c0_5 = arith.constant 0 : index
    %c0_6 = arith.constant 0 : index
    %4 = vector.load %arg5[%c0_5, %c0_6] : memref<32x128xf32, #tpu.memory_space<vmem>>, vector<32x128xf32>
    %cst_7 = arith.constant dense<0.000000e+00> : vector<2x128xf32>
    %5 = tpu.matmul %3, %4, %cst_7 {dimension_numbers = #tpu.dot_dimension_numbers<[1], [0], [0], [1], [0, 0, 1, 1], [], []>} : vector<2x32xf32>, vector<32x128xf32>, vector<2x128xf32> -> vector<2x128xf32>
    %6 = arith.addf %2, %5 : vector<2x128xf32>
    %c0_8 = arith.constant 0 : index
    %c0_9 = arith.constant 0 : index
    %7 = vector.load %arg6[%c0_8, %c0_9] : memref<1x128xf32, #tpu.memory_space<vmem>>, vector<1x128xf32>
    %8 = vector.broadcast %7 : vector<1x128xf32> to vector<2x128xf32>
    %9 = arith.addf %6, %8 : vector<2x128xf32>
    %10 = vector.extract_strided_slice %9 {offsets = [0, 0], sizes = [2, 32], strides = [1, 1]} : vector<2x128xf32> to vector<2x32xf32>
    %cst_10 = arith.constant 5.000000e-01 : f32
    %11 = vector.broadcast %cst_10 : f32 to vector<2x32xf32>
    %12 = arith.mulf %11, %10 : vector<2x32xf32>
    %13 = math.tanh %12 : vector<2x32xf32>
    %cst_11 = arith.constant 1.000000e+00 : f32
    %14 = vector.broadcast %cst_11 : f32 to vector<2x32xf32>
    %15 = arith.addf %13, %14 : vector<2x32xf32>
    %cst_12 = arith.constant 5.000000e-01 : f32
    %16 = vector.broadcast %cst_12 : f32 to vector<2x32xf32>
    %17 = arith.mulf %16, %15 : vector<2x32xf32>
    %18 = vector.extract_strided_slice %9 {offsets = [0, 32], sizes = [2, 32], strides = [1, 1]} : vector<2x128xf32> to vector<2x32xf32>
    %cst_13 = arith.constant 5.000000e-01 : f32
    %19 = vector.broadcast %cst_13 : f32 to vector<2x32xf32>
    %20 = arith.mulf %19, %18 : vector<2x32xf32>
    %21 = math.tanh %20 : vector<2x32xf32>
    %cst_14 = arith.constant 1.000000e+00 : f32
    %22 = vector.broadcast %cst_14 : f32 to vector<2x32xf32>
    %23 = arith.addf %21, %22 : vector<2x32xf32>
    %cst_15 = arith.constant 5.000000e-01 : f32
    %24 = vector.broadcast %cst_15 : f32 to vector<2x32xf32>
    %25 = arith.mulf %24, %23 : vector<2x32xf32>
    %26 = vector.extract_strided_slice %9 {offsets = [0, 64], sizes = [2, 32], strides = [1, 1]} : vector<2x128xf32> to vector<2x32xf32>
    %cst_16 = arith.constant 5.000000e-01 : f32
    %27 = vector.broadcast %cst_16 : f32 to vector<2x32xf32>
    %28 = arith.mulf %27, %26 : vector<2x32xf32>
    %29 = math.tanh %28 : vector<2x32xf32>
    %cst_17 = arith.constant 1.000000e+00 : f32
    %30 = vector.broadcast %cst_17 : f32 to vector<2x32xf32>
    %31 = arith.addf %29, %30 : vector<2x32xf32>
    %cst_18 = arith.constant 5.000000e-01 : f32
    %32 = vector.broadcast %cst_18 : f32 to vector<2x32xf32>
    %33 = arith.mulf %32, %31 : vector<2x32xf32>
    %34 = vector.extract_strided_slice %9 {offsets = [0, 96], sizes = [2, 32], strides = [1, 1]} : vector<2x128xf32> to vector<2x32xf32>
    %35 = math.tanh %34 : vector<2x32xf32>
    %c0_19 = arith.constant 0 : index
    %c0_20 = arith.constant 0 : index
    %36 = vector.load %arg3[%c0_19, %c0_20] : memref<2x32xf32, #tpu.memory_space<vmem>>, vector<2x32xf32>
    %37 = arith.mulf %25, %36 : vector<2x32xf32>
    %38 = arith.mulf %17, %35 : vector<2x32xf32>
    %39 = arith.addf %37, %38 : vector<2x32xf32>
    %40 = math.tanh %39 : vector<2x32xf32>
    %41 = arith.mulf %33, %40 : vector<2x32xf32>
    %c0_21 = arith.constant 0 : index
    %c0_22 = arith.constant 0 : index
    %42 = vector.load %arg7[%c0_21, %c0_22] : memref<2x64xf32, #tpu.memory_space<vmem>>, vector<2x32xf32>
    tpu.vector_store %arg7[%c0_21, %c0_22], %41 {strides = array<i32>} : memref<2x64xf32, #tpu.memory_space<vmem>>, vector<2x32xf32>,
    %c0_23 = arith.constant 0 : index
    %c32 = arith.constant 32 : index
    %43 = vector.load %arg7[%c0_23, %c32] : memref<2x64xf32, #tpu.memory_space<vmem>>, vector<2x32xf32>
    tpu.vector_store %arg7[%c0_23, %c32], %39 {strides = array<i32>} : memref<2x64xf32, #tpu.memory_space<vmem>>, vector<2x32xf32>,
    return
  }
  func.func @transform_0(%arg0: i32) -> (i32, i32) {
    %c0_i32 = arith.constant 0 : i32
    %c0_i32_0 = arith.constant 0 : i32
    return %arg0, %c0_i32 : i32, i32
  }
  func.func @transform_1(%arg0: i32) -> (i32, i32) {
    %c0_i32 = arith.constant 0 : i32
    %c0_i32_0 = arith.constant 0 : i32
    return %arg0, %c0_i32 : i32, i32
  }
  func.func @transform_2(%arg0: i32) -> (i32, i32) {
    %c0_i32 = arith.constant 0 : i32
    %c0_i32_0 = arith.constant 0 : i32
    return %arg0, %c0_i32 : i32, i32
  }
  func.func @transform_3(%arg0: i32) -> (i32, i32) {
    %c0_i32 = arith.constant 0 : i32
    %c0_i32_0 = arith.constant 0 : i32
    %c0_i32_1 = arith.constant 0 : i32
    return %c0_i32, %c0_i32_0 : i32, i32
  }
  func.func @transform_4(%arg0: i32) -> (i32, i32) {
    %c0_i32 = arith.constant 0 : i32
    %c0_i32_0 = arith.constant 0 : i32
    %c0_i32_1 = arith.constant 0 : i32
    return %c0_i32, %c0_i32_0 : i32, i32
  }
  func.func @transform_5(%arg0: i32) -> (i32, i32) {
    %c0_i32 = arith.constant 0 : i32
    %c0_i32_0 = arith.constant 0 : i32
    %c0_i32_1 = arith.constant 0 : i32
    return %c0_i32, %c0_i32_0 : i32, i32
  }
  func.func @transform_6(%arg0: i32) -> (i32, i32) {
    %c0_i32 = arith.constant 0 : i32
    %c0_i32_0 = arith.constant 0 : i32
    return %arg0, %c0_i32 : i32, i32
  }
}

</mosaic_0001>

<bundles_post_ra>
// kernel: tpu_custom_call.1
= control target key start
LH: loop header
LB: loop body
LE: loop exit
PB: predicated region body
PF: predicated region fallthrough
CT: control target
= control target key end

     0   :  { %11 = vsyncpa [#allocation3], 0  ;;  %s450_s0 = inlined_call_operand.hbm [shape: f32[2,4], index: 0, kind: input, shape index: {}]   ;;  %s451_s1 = inlined_call_operand.hbm [shape: f32[2,32], index: 1, kind: input, shape index: {}]   ;;  %s452_s2 = inlined_call_operand.hbm [shape: f32[2,32], index: 2, kind: input, shape index: {}]   ;;  %s453_s3 = inlined_call_operand.hbm [shape: f32[4,128], index: 3, kind: input, shape index: {}]   ;;  %s454_s4 = inlined_call_operand.hbm [shape: f32[32,128], index: 4, kind: input, shape index: {}]   ;;  %s455_s5 = inlined_call_operand.vmem [shape: f32[1,128], index: 5, kind: input, shape index: {}]   ;;  %s456_s6 = inlined_call_operand.hbm [shape: f32[2,64], index: 6, kind: output, shape index: {}]  }
   0x1   :  { %12 = vsyncpa [#allocation6], 0 }
   0x2   :  { %13 = vsyncpa [#allocation9], 0  ;;  %s31_s23 = sshll.u32 %s451_s1, 4  ;;  %s32_s23 = int_to_ptr.hbm [resolvable:$true] %s31_s23 }
   0x3   :  { %14 = vsyncpa [#allocation4], 0  ;;  %s384_s24 = smov [#allocation5]   ;;  %s53_s28 = sshll.u32 %s453_s3, 4  ;;  %s54_s28 = int_to_ptr.hbm [resolvable:$true] %s53_s28 }
   0x4   :  { %s33_s25 = sshll.u32 %s384_s24, 4  ;;  %s385_s29 = smov [#allocation8]   ;;  %s34_s25 = int_to_ptr.vmem [resolvable:$true] %s33_s25 }
   0x5   :  { %36 = dma.hbm_to_vmem [thread:$0]  %s32_s23, 32, %s34_s25, [#allocation6]  }
   0x6   :  { %s55_s30 = sshll.u32 %s385_s29, 4  ;;  %s20_s9 = sshll.u32 %s450_s0, 4  ;;  %s56_s30 = int_to_ptr.vmem [resolvable:$true] %s55_s30  ;;  %s21_s9 = int_to_ptr.hbm [resolvable:$true] %s20_s9 }
   0x7   :  { %58 = dma.hbm_to_vmem [thread:$0]  %s54_s28, 64, %s56_s30, [#allocation9]  }
   0x8   :  { %s42_s11 = sshll.u32 %s452_s2, 4  ;;  %s386_s12 = smov [#allocation2]   ;;  %s43_s11 = int_to_ptr.hbm [resolvable:$true] %s42_s11 }
   0x9   :  { %s22_s13 = sshll.u32 %s386_s12, 4  ;;  %s387_s3 = smov [#allocation7]   ;;  %s23_s13 = int_to_ptr.vmem [resolvable:$true] %s22_s13 }
   0xa   :  { %25 = dma.hbm_to_vmem [thread:$0]  %s21_s9, 32, %s23_s13, [#allocation3]  }
   0xb   :  { %s44_s14 = sshll.u32 %s387_s3, 4  ;;  %s63_s17 = sshll.u32 %s454_s4, 4  ;;  %s45_s14 = int_to_ptr.vmem [resolvable:$true] %s44_s14  ;;  %s64_s17 = int_to_ptr.hbm [resolvable:$true] %s63_s17 }
   0xc   :  { %47 = dma.hbm_to_vmem [thread:$0]  %s43_s11, 32, %s45_s14, [#allocation6]  }
   0xd   :  { %s388_s0 = smov [#allocation10]   ;;  %s389_s19 = smov 128  }
   0xe   :  { %s65_s18 = sshll.u32 %s388_s0, 4  ;;  %s390_s20 = smov 8   ;;  %s66_s18 = int_to_ptr.vmem [resolvable:$true] %s65_s18 }
   0xf   :  { %71 = dma.hbm_to_vmem [thread:$0]  %s64_s17, 512, %s66_s18, [#allocation9], %s389_s19, %s389_s19, %s390_s20  }
  0x10   :  { %376 = dma.done.wait [#allocation3], 32  }
  0x11   :  { %377 = vsyncadd [#allocation3], 4294967264 }
  0x12   :  { %378 = dma.done.wait [#allocation6], 64  }
  0x13   :  { %379 = vsyncadd [#allocation6], 4294967232 }
  0x14   :  { %380 = dma.done.wait [#allocation9], 576  }
  0x15   :  { %381 = vsyncadd [#allocation9], 4294966720  ;;  %vm129_vm0 = vcmask 1043456   ;;  %v100_v0 = vld [vmem:[#allocation10 + $0x18] sm:$0xff]  ;;  %v99_v1 = vld [vmem:[#allocation10 + $0x10] sm:$0xff]  ;;  %vm125_vm1 = vcmask 31744  }
  0x16   :  { %117 = vmatpush.msra.mxu0 %v100_v0  ;;  %v95_v2 = vld [vmem:[#allocation8] sm:$0xf]  ;;  %v98_v3 = vld [vmem:[#allocation10 + $0x8] sm:$0xff]  ;;  %v94_v4 = vld [vmem:[#allocation2] sm:$0x3]  ;;  %vm101_vm2 = vcmask 261120  }
  0x17   :  { %213 = vmatpush.msk.msra.mxu1 %vm129_vm0, %v95_v2  ;;  %v97_v5 = vld [vmem:[#allocation10] sm:$0xff]  ;;  %v96_v6 = vld [vmem:[#allocation5] sm:$0x3]  ;;  %v225_v8 = vld [vmem:[%s455_s5] ss:$0 sm:$0xff]  ;;  %s391_s21 = smov 32  }
  0x18   :  { %118 = vmatpush.msra.mxu0 %v99_v1  ;;  %214 = vmatmul.msk.f32.vlgmr.msra.gmra.mxu1 %vm125_vm1, %v94_v4  ;;  %v163_v13 = vld [vmem:[#allocation7] sm:$0x3]  ;;  %s392_s5 = smov 64   ;;  %s393_s22 = smov [#allocation11]   ;;  %vm189_vm3 = vcmask 254976   ;;  %vm191_vm4 = vcmask 517376  }
  0x19   :  { %s198_s23 = sshll.u32 %s393_s22, 4  ;;  %s200_s26 = sshll.u32 %s456_s6, 4  ;;  %s199_s23 = int_to_ptr.vmem [resolvable:$true] %s198_s23  ;;  %s201_s26 = int_to_ptr.hbm [resolvable:$true] %s200_s26 }
  0x1a   :  { %119 = vmatpush.msra.mxu0 %v98_v3 }
  0x1c   :  { %120 = vmatpush.msra.mxu0 %v97_v5 }
  0x1d   :  { %212 = vmatmul.msk.f32.vlgmr.msra.gmra.mxu0 %vm101_vm2, %v96_v6 }
  0x95   :  { %v150_v7 = vpop.f32.mrf.mxu1 }
  0x9a   :  { %v122_v9 = vpop.f32.mrf.mxu0 }
  0x9b   :  { %v151_v10 = vadd.f32 %v150_v7, %v122_v9 }
  0x9d   :  { %v157_v11 = vadd.f32 %v225_v8, %v151_v10 }
  0x9f   :  { %226 = vtanh.f32 %v157_v11  ;;  %v158_v14 = vmul.f32 0.5, %v157_v11 }
  0xa1   :  { %228 = vtanh.f32 %v158_v14 }
  0xa5   :  { %v227_v12 = vpop.eup %226 }
  0xa6   :  { %170 = vrot.lane.b32.xlu0 %v227_v12, %s391_s21 }
  0xa7   :  { %v229_v15 = vpop.eup %228 }
  0xa8   :  { %v160_v16 = vadd.f32 1.0, %v229_v15 }
  0xaa   :  { %v161_v17 = vmul.f32 0.5, %v160_v16 }
  0xae   :  { %165 = vrot.lane.b32.xlu0 %v163_v13, %s391_s21 }
 0x118   :  { %v171_v18 = vpop.permute.xlu0 %170 }
 0x119   :  { %v173_v19 = vmul.f32 %v171_v18, %v161_v17 }
 0x11b   :  { %175 = vrot.lane.b32.xlu1 %v173_v19, %s391_s21 }
 0x120   :  { %v166_v20 = vpop.permute.xlu0 %165 }
 0x121   :  { %v168_v21 = vmul.f32 %v166_v20, %v161_v17 }
 0x18d   :  { %v176_v22 = vpop.permute.xlu1 %175 }
 0x18e   :  { %v178_v23 = vadd.f32 %v176_v22, %v168_v21 }
 0x190   :  { %230 = vtanh.f32 %v178_v23 }
 0x196   :  { %v231_v24 = vpop.eup %230 }
 0x197   :  { %181 = vrot.lane.b32.xlu1 %v231_v24, %s391_s21 }
 0x209   :  { %v182_v25 = vpop.permute.xlu1 %181 }
 0x20a   :  { %v184_v26 = vmul.f32 %v182_v25, %v161_v17 }
 0x20c   :  { %186 = vrot.lane.b32.xlu2 %v184_v26, %s392_s5 }
 0x266   :  { %v187_v27 = vpop.permute.xlu2 %186 }
 0x267   :  { %190 = vst.msk [vmem:[#allocation11] sm:$0x3] %vm189_vm3, %v187_v27 }
 0x268   :  { %192 = vst.msk [vmem:[#allocation11] sm:$0x3] %vm191_vm4, %v178_v23 }
 0x269   :  { %203 = dma.vmem_to_hbm [thread:$0]  %s199_s23, 32, %s201_s26, [#allocation4]  }
 0x26a   :  { %382 = dma.done.wait [#allocation4], 32  }
 0x26b   :  { %383 = vsyncadd [#allocation4], 4294967264 }
 0x26c   :  { %208 = vsyncpa [#allocation3], 1 }
 0x26d   :  { %209 = vsyncpa [#allocation6], 1 }
 0x26e   :  { %210 = vsyncpa [#allocation9], 1 }
 0x26f   :  { %211 = vsyncpa [#allocation4], 1 }

</bundles_post_ra>
